<compile_context>
chip_gen: v7x
topology: tpu7x:2x2x1
jax: 0.10.0
libtpu: 0.0.40
codegen_flags: <defaults>
</compile_context>

<pallas_src>
import functools

import jax
import jax.numpy as jnp
from jax import lax
from jax.experimental import pallas as pl
from jax.experimental.pallas import tpu as pltpu


def _round_up(x, m):
    return ((x + m - 1) // m) * m


def _linear_bias_kernel(x_ref, w_ref, b_ref, o_ref, acc_ref):
    # grid = (Np//tm, Vp//tn, Hp//tk); reduction axis (k) is last.
    @pl.when(pl.program_id(2) == 0)
    def _():
        acc_ref[...] = jnp.zeros_like(acc_ref)

    # x_ref: (tm, tk) bf16 ; w_ref: (tn, tk) bf16 (PyTorch (V, H) layout).
    # Contract the shared tk axis on the MXU with a float32 accumulator.
    acc_ref[...] += lax.dot_general(
        x_ref[...],
        w_ref[...],
        dimension_numbers=(((1,), (1,)), ((), ())),
        preferred_element_type=jnp.float32,
    )

    @pl.when(pl.program_id(2) == pl.num_programs(2) - 1)
    def _():
        # b_ref is (1, tn) float32; broadcasts over the tm rows of the tile.
        o_ref[...] = (acc_ref[...] + b_ref[...]).astype(o_ref.dtype)


@functools.partial(jax.jit, static_argnames=("tm", "tn", "tk"))
def output_embedding(x, weight, bias, *, tm=256, tn=1024, tk=512):
    """y = x @ weight.T + bias, computed with a Pallas TPU kernel.

    x:      (..., H)
    weight: (V, H)   (PyTorch F.linear convention; NOT transposed in HBM)
    bias:   (V,)
    """
    orig_shape = x.shape
    H = orig_shape[-1]
    V, Hw = weight.shape
    assert Hw == H, "weight last dim must match x last dim"
    x2d = x.reshape(-1, H)
    N = x2d.shape[0]
    out_dtype = x.dtype
    out_itemsize = jnp.dtype(out_dtype).itemsize

    # ---- adaptive tile sizes (clip targets to the padded problem size) -----
    tm = min(tm, _round_up(N, 8))        # sublane-aligned rows
    tn = min(tn, _round_up(V, 128))      # lane-dense output columns
    # Full-dim K block is always legal (no (8,128) constraint); otherwise use a
    # 128-multiple K tile and pad H up to a tile multiple.
    tk = H if H <= tk else tk

    Np = _round_up(N, tm)
    Vp = _round_up(V, tn)
    Hp = H if tk == H else _round_up(H, tk)

    # ---- bf16 matmul operands (f32 accumulation in-kernel keeps accuracy) --
    x_mm = x2d.astype(jnp.bfloat16)
    w_mm = weight.astype(jnp.bfloat16)
    b2d = bias.astype(jnp.float32).reshape(1, V)

    if (Np, Hp) != (N, H):
        x_mm = jnp.pad(x_mm, ((0, Np - N), (0, Hp - H)))
    if (Vp, Hp) != (V, H):
        w_mm = jnp.pad(w_mm, ((0, Vp - V), (0, Hp - H)))
    if Vp != V:
        b2d = jnp.pad(b2d, ((0, 0), (0, Vp - V)))

    grid = (Np // tm, Vp // tn, Hp // tk)

    # ---- VMEM budget: double-buffered inputs/outputs + f32 accumulator -----
    tile_bytes = (
        2 * tm * tk * 2            # x tile (bf16), double-buffered
        + 2 * tn * tk * 2          # W tile (bf16), double-buffered
        + 2 * 1 * tn * 4           # bias tile (f32), double-buffered
        + 2 * tm * tn * out_itemsize  # output tile, double-buffered
        + tm * tn * 4              # f32 accumulator scratch
    )
    # Margin for compiler temporaries; cap well under v7x's 64 MiB physical VMEM.
    vmem_limit = min(int(tile_bytes * 1.5) + (4 << 20), 48 << 20)

    cost = pl.CostEstimate(
        flops=2 * Np * Hp * Vp,
        transcendentals=0,
        bytes_accessed=(
            Np * Hp * 2 + Vp * Hp * 2 + Np * Vp * out_itemsize + Vp * 4
        ),
    )

    out = pl.pallas_call(
        _linear_bias_kernel,
        out_shape=jax.ShapeDtypeStruct((Np, Vp), out_dtype),
        grid_spec=pltpu.PrefetchScalarGridSpec(
            num_scalar_prefetch=0,
            grid=grid,
            in_specs=[
                pl.BlockSpec((tm, tk), lambda i, j, k: (i, k)),  # x tile
                pl.BlockSpec((tn, tk), lambda i, j, k: (j, k)),  # W tile (V,H)
                pl.BlockSpec((1, tn), lambda i, j, k: (0, j)),   # bias tile
            ],
            out_specs=pl.BlockSpec((tm, tn), lambda i, j, k: (i, j)),
            scratch_shapes=[pltpu.VMEM((tm, tn), jnp.float32)],
        ),
        compiler_params=pltpu.CompilerParams(
            dimension_semantics=("parallel", "parallel", "arbitrary"),
            vmem_limit_bytes=vmem_limit,
        ),
        cost_estimate=cost,
    )(x_mm, w_mm, b2d)

    out = out[:N, :V]
    return out.reshape(*orig_shape[:-1], V)


if __name__ == "__main__":
    # Small shapes implied by the forward: x (B, S, H), tied weight (V, H), bias (V,)
    B, S, H, V = 2, 8, 64, 256

    key = jax.random.PRNGKey(0)
    kx, kw, kb = jax.random.split(key, 3)

    x = jax.random.normal(kx, (B, S, H), dtype=jnp.float32)
    # self.weight() in the module is a callable returning the tied embedding
    # matrix; here we synthesize it deterministically.
    weight = jax.random.normal(kw, (V, H), dtype=jnp.float32) * 0.02
    bias = jax.random.normal(kb, (V,), dtype=jnp.float32) * 0.01

    y = jax.block_until_ready(output_embedding(x, weight, bias))
    assert y.shape == (B, S, V)

    # Tight check against a reference in the same regime as the kernel
    # (bf16 operands, f32 accumulation).
    y_ref_bf16 = (
        x.astype(jnp.bfloat16).astype(jnp.float32).reshape(-1, H)
        @ weight.astype(jnp.bfloat16).astype(jnp.float32).T
    ).reshape(B, S, V) + bias
    assert jnp.allclose(y, y_ref_bf16, atol=1e-4, rtol=1e-4)

    # Loose check against exact F.linear semantics (bf16 operand rounding).
    y_ref = x @ weight.T + bias
    assert jnp.allclose(y, y_ref, atol=2e-2, rtol=2e-2)

    # Ragged shapes: exercise the padding path (N, V, H not tile multiples).
    x2 = jax.random.normal(kx, (3, 5, 48), dtype=jnp.float32)
    w2 = jax.random.normal(kw, (200, 48), dtype=jnp.float32) * 0.02
    b2 = jax.random.normal(kb, (200,), dtype=jnp.float32) * 0.01
    y2 = jax.block_until_ready(output_embedding(x2, w2, b2))
    assert y2.shape == (3, 5, 200)
    assert jnp.allclose(y2, x2 @ w2.T + b2, atol=2e-2, rtol=2e-2)

    print("KERNEL_OK")
</pallas_src>

<mosaic_0001>
module attributes {stable_mosaic.version = 11 : i64} {
  func.func @_linear_bias_kernel(%arg0: i32, %arg1: i32, %arg2: i32, %arg3: memref<16x64xbf16, #tpu.memory_space<vmem>>, %arg4: memref<256x64xbf16, #tpu.memory_space<vmem>>, %arg5: memref<1x256xf32, #tpu.memory_space<vmem>>, %arg6: memref<16x256xf32, #tpu.memory_space<vmem>>, %arg7: memref<16x256xf32, #tpu.memory_space<vmem>>) attributes {dimension_semantics = [#tpu.dimension_semantics<parallel>, #tpu.dimension_semantics<parallel>, #tpu.dimension_semantics<arbitrary>], iteration_bounds = array<i64: 1, 1, 1>, scalar_prefetch = 0 : i64, scratch_operands = 1 : i64, tpu.core_type = #tpu.core_type<tc>, window_params = [{transform_indices = @transform_0, window_bounds = array<i64: 16, 64>}, {transform_indices = @transform_1, window_bounds = array<i64: 256, 64>}, {transform_indices = @transform_2, window_bounds = array<i64: 1, 256>}, {transform_indices = @transform_3, window_bounds = array<i64: 16, 256>}]} {
    %c0_i32 = arith.constant 0 : i32
    %0 = arith.cmpi eq, %arg2, %c0_i32 : i32
    %1 = arith.extui %0 : i1 to i32
    %c0_i32_0 = arith.constant 0 : i32
    %2 = arith.cmpi ne, %1, %c0_i32_0 : i32
    scf.if %2 {
      %cst_10 = arith.constant 0.000000e+00 : f32
      %12 = vector.broadcast %cst_10 : f32 to vector<16x256xf32>
      %c0_11 = arith.constant 0 : index
      %c0_12 = arith.constant 0 : index
      %13 = vector.load %arg7[%c0_11, %c0_12] : memref<16x256xf32, #tpu.memory_space<vmem>>, vector<16x256xf32>
      tpu.vector_store %arg7[%c0_11, %c0_12], %12 {strides = array<i32>} : memref<16x256xf32, #tpu.memory_space<vmem>>, vector<16x256xf32>,
    } else {
    }
    %c0 = arith.constant 0 : index
    %c0_1 = arith.constant 0 : index
    %3 = vector.load %arg7[%c0, %c0_1] : memref<16x256xf32, #tpu.memory_space<vmem>>, vector<16x256xf32>
    %c0_2 = arith.constant 0 : index
    %c0_3 = arith.constant 0 : index
    %4 = vector.load %arg3[%c0_2, %c0_3] : memref<16x64xbf16, #tpu.memory_space<vmem>>, vector<16x64xbf16>
    %c0_4 = arith.constant 0 : index
    %c0_5 = arith.constant 0 : index
    %5 = vector.load %arg4[%c0_4, %c0_5] : memref<256x64xbf16, #tpu.memory_space<vmem>>, vector<256x64xbf16>
    %cst = arith.constant dense<0.000000e+00> : vector<16x256xf32>
    %6 = tpu.matmul %4, %5, %cst {dimension_numbers = #tpu.dot_dimension_numbers<[1], [1], [0], [0], [0, 0, 1, 0], [], []>} : vector<16x64xbf16>, vector<256x64xbf16>, vector<16x256xf32> -> vector<16x256xf32>
    %7 = arith.addf %3, %6 : vector<16x256xf32>
    %c0_6 = arith.constant 0 : index
    %c0_7 = arith.constant 0 : index
    %8 = vector.load %arg7[%c0_6, %c0_7] : memref<16x256xf32, #tpu.memory_space<vmem>>, vector<16x256xf32>
    tpu.vector_store %arg7[%c0_6, %c0_7], %7 {strides = array<i32>} : memref<16x256xf32, #tpu.memory_space<vmem>>, vector<16x256xf32>,
    %c0_i32_8 = arith.constant 0 : i32
    %9 = arith.cmpi eq, %arg2, %c0_i32_8 : i32
    %10 = arith.extui %9 : i1 to i32
    %c0_i32_9 = arith.constant 0 : i32
    %11 = arith.cmpi ne, %10, %c0_i32_9 : i32
    scf.if %11 {
      %c0_10 = arith.constant 0 : index
      %c0_11 = arith.constant 0 : index
      %12 = vector.load %arg7[%c0_10, %c0_11] : memref<16x256xf32, #tpu.memory_space<vmem>>, vector<16x256xf32>
      %c0_12 = arith.constant 0 : index
      %c0_13 = arith.constant 0 : index
      %13 = vector.load %arg5[%c0_12, %c0_13] : memref<1x256xf32, #tpu.memory_space<vmem>>, vector<1x256xf32>
      %14 = vector.broadcast %13 : vector<1x256xf32> to vector<16x256xf32>
      %15 = arith.addf %12, %14 : vector<16x256xf32>
      %c0_14 = arith.constant 0 : index
      %c0_15 = arith.constant 0 : index
      %16 = vector.load %arg6[%c0_14, %c0_15] : memref<16x256xf32, #tpu.memory_space<vmem>>, vector<16x256xf32>
      tpu.vector_store %arg6[%c0_14, %c0_15], %15 {strides = array<i32>} : memref<16x256xf32, #tpu.memory_space<vmem>>, vector<16x256xf32>,
    } else {
    }
    return
  }
  func.func @transform_0(%arg0: i32, %arg1: i32, %arg2: i32) -> (i32, i32) {
    %c0_i32 = arith.constant 0 : i32
    return %arg0, %arg2 : i32, i32
  }
  func.func @transform_1(%arg0: i32, %arg1: i32, %arg2: i32) -> (i32, i32) {
    %c0_i32 = arith.constant 0 : i32
    return %arg1, %arg2 : i32, i32
  }
  func.func @transform_2(%arg0: i32, %arg1: i32, %arg2: i32) -> (i32, i32) {
    %c0_i32 = arith.constant 0 : i32
    %c0_i32_0 = arith.constant 0 : i32
    return %c0_i32, %arg1 : i32, i32
  }
  func.func @transform_3(%arg0: i32, %arg1: i32, %arg2: i32) -> (i32, i32) {
    %c0_i32 = arith.constant 0 : i32
    return %arg0, %arg1 : i32, i32
  }
}

</mosaic_0001>

<bundles_post_ra>
// kernel: output_embedding.1
= control target key start
LH: loop header
LB: loop body
LE: loop exit
PB: predicated region body
PF: predicated region fallthrough
CT: control target
= control target key end

     0   :  { %vm147_vm0 = vcmask 523264   ;;  %s488_s0 = inlined_call_operand.vmem [shape: bf16[16,64], index: 0, kind: input, shape index: {}]   ;;  %s489_s1 = inlined_call_operand.vmem [shape: bf16[256,64], index: 1, kind: input, shape index: {}]   ;;  %s490_s2 = inlined_call_operand.vmem [shape: f32[1,256], index: 2, kind: input, shape index: {}]   ;;  %s491_s3 = inlined_call_operand.hbm [shape: f32[16,256], index: 3, kind: output, shape index: {}]  }
   0x1   :  { %v340_v0 = vld [vmem:[%s489_s1 + $0x40] sm:$0xff]   ;;  %v342_v2 = vld [vmem:[%s489_s1 + $0x48] sm:$0xff]   ;;  %v344_v6 = vld [vmem:[%s489_s1 + $0x50] sm:$0xff]  }
   0x2   :  { %v341_v1 = vld [vmem:[%s489_s1] sm:$0xff]   ;;  %329 = vmatprep.subr.msk.bf16.mxu0 %vm147_vm0, %v340_v0  ;;  %v343_v4 = vld [vmem:[%s489_s1 + $0x8] sm:$0xff]   ;;  %v345_v7 = vld [vmem:[%s489_s1 + $0x10] sm:$0xff]  }
   0x3   :  { %v152_v3 = vsel %vm147_vm0, %v341_v1, 0  ;;  %v155_v5 = vsel %vm147_vm0, %v343_v4, 0  ;;  %v356_v8 = vld [vmem:[%s488_s0] sm:$0xff]   ;;  %v158_v9 = vsel %vm147_vm0, %v345_v7, 0  ;;  %v346_v10 = vld [vmem:[%s489_s1 + $0x58] sm:$0xff]  }
   0x4   :  { %312 = vmatpush3.bf16.xpose.msra.mxu0 %v152_v3 }
   0x5   :  { %330 = vmatprep.subr.msk.bf16.mxu0 %vm147_vm0, %v342_v2 }
   0xc   :  { %314 = vmatpush3.bf16.xpose.msra.mxu0 %v155_v5 }
   0xd   :  { %331 = vmatprep.subr.msk.bf16.mxu0 %vm147_vm0, %v344_v6 }
   0xe   :  { %8 = vsyncpa [#allocation4], 0  ;;  %327 = vmatprep.mubr.msk.bf16.mxu0 %vm147_vm0, %v356_v8  ;;  %v347_v11 = vld [vmem:[%s489_s1 + $0x18] sm:$0xff]   ;;  %v348_v13 = vld [vmem:[%s489_s1 + $0x60] sm:$0xff]   ;;  %v259_v25 = vlaneseq  ;;  %s381_s20 = smov [#allocation3]  }
   0xf   :  { %v161_v12 = vsel %vm147_vm0, %v347_v11, 0  ;;  %v349_v14 = vld [vmem:[%s489_s1 + $0x20] sm:$0xff]   ;;  %v350_v16 = vld [vmem:[%s489_s1 + $0x68] sm:$0xff]   ;;  %v352_v19 = vld [vmem:[%s489_s1 + $0x70] sm:$0xff]   ;;  %s282_s21 = sshll.u32 %s381_s20, 4  ;;  %s283_s21 = int_to_ptr.vmem [resolvable:$true] %s282_s21 }
  0x10   :  { %v164_v15 = vsel %vm147_vm0, %v349_v14, 0  ;;  %v351_v17 = vld [vmem:[%s489_s1 + $0x28] sm:$0xff]   ;;  %v353_v20 = vld [vmem:[%s489_s1 + $0x30] sm:$0xff]   ;;  %v354_v22 = vld [vmem:[%s489_s1 + $0x78] sm:$0xff]   ;;  %v260_v26 = vshrl.u32 %v259_v25, 7  ;;  %p362_p1 = scmp.lt.s32.totalorder %s283_s21, %s283_s21 }
  0x11   :  { %v167_v18 = vsel %vm147_vm0, %v351_v17, 0  ;;  %v170_v21 = vsel %vm147_vm0, %v353_v20, 0  ;;  %v355_v23 = vld [vmem:[%s489_s1 + $0x38] sm:$0xff]   ;;  %v257_v28 = vld [vmem:[%s490_s2] sm:$0x3]  ;;  %s357_s1 = scalar_lea.vmem %s283_s21, 512 }
  0x12   :  { %v173_v24 = vsel %vm147_vm0, %v355_v23, 0  ;;  %v261_v27 = vsub.s32 0, %v260_v26  ;;  %v265_v29 = vsub.s32 1, %v260_v26  ;;  %p358_p0 = scmp.ne.s32.totalorder %s283_s21, %s357_s1  ;;  %p363_p2 = scmp.lt.s32.totalorder %s357_s1, %s357_s1 }
  0x14   :  { %316 = vmatpush3.bf16.xpose.msra.mxu0 %v158_v9  ;;  %v262_v30 = vrot.slane %v257_v28, %v261_v27  ;;  %v266_v31 = vrot.slane %v257_v28, %v265_v29  ;;  %p364_p3 = por %p363_p2, %p362_p1 }
  0x15   :  { %332 = vmatprep.subr.msk.bf16.mxu0 %vm147_vm0, %v346_v10 }
  0x16   :  { %p365_p4 = pnand %p364_p3, %p358_p0 }
  0x1c   :  { %318 = vmatpush3.bf16.xpose.msra.mxu0 %v161_v12 }
  0x1d   :  { %333 = vmatprep.subr.msk.bf16.mxu0 %vm147_vm0, %v348_v13 }
  0x24   :  { %320 = vmatpush3.bf16.xpose.msra.mxu0 %v164_v15 }
  0x25   :  { %334 = vmatprep.subr.msk.bf16.mxu0 %vm147_vm0, %v350_v16 }
  0x2c   :  { %322 = vmatpush3.bf16.xpose.msra.mxu0 %v167_v18 }
  0x2d   :  { %335 = vmatprep.subr.msk.bf16.mxu0 %vm147_vm0, %v352_v19 }
  0x34   :  { %324 = vmatpush3.bf16.xpose.msra.mxu0 %v170_v21 }
  0x35   :  { %336 = vmatprep.subr.msk.bf16.mxu0 %vm147_vm0, %v354_v22 }
  0x3c   :  { %326 = vmatpush3.bf16.xpose.msra.mxu0 %v173_v24 }
  0x43   :  { %328 = vmatmul.mubr.msk.bf16.vlgmr.msra.gmra.mrb[0].mxu0 %vm147_vm0, %v356_v8 }
 0x116   :  { %v233_v32 = vpop.f32.mrb[0].mxu0 }
 0x117   :  { %v269_v33 = vadd.f32 %v262_v30, %v233_v32  ;;  %v235_v34 = vpop.f32.mrb[1].mxu0 }
 0x118   :  { %v270_v35 = vadd.f32 %v266_v31, %v235_v34  ;;  %v237_v36 = vpop.f32.mrb[2].mxu0 }
 0x119   :  { %273 = vst [vmem:[#allocation3] sm:$0xff] %v269_v33  ;;  %v271_v37 = vadd.f32 %v262_v30, %v237_v36  ;;  %v239_v38 = vpop.f32.mrb[3].mxu0 }
 0x11a   :  { %274 = vst [vmem:[#allocation3 + $0x8] sm:$0xff] %v270_v35  ;;  %v272_v39 = vadd.f32 %v266_v31, %v239_v38 }
 0x11b   :  { %275 = vst [vmem:[#allocation3 + $0x10] sm:$0xff] %v271_v37 }
 0x11c   :  { %276 = vst [vmem:[#allocation3 + $0x18] sm:$0xff] %v272_v39 }
 0x11d   :  { %368 = shalt.err (!%p365_p4)
}
 0x11e   :  { %s369_s23 = scalar_lea.hbm %s491_s3, 512 }
 0x11f   :  { %p370_p5 = scmp.ne.s32.totalorder %s491_s3, %s369_s23  ;;  %p373_p6 = scmp.lt.u32.totalorder %s369_s23, %s491_s3 }
 0x121   :  { %p375_p7 = pnand %p373_p6, %p370_p5 }
 0x123   :  { %378 = shalt.err (!%p375_p7)
}
 0x124   :  { %s382_s28 = smov 256   ;;  %s383_s29 = smov 16  }
 0x125   :  { %288 = dma.vmem_to_hbm [thread:$0]  %s283_s21, 512, %s491_s3, [#allocation4], %s382_s28, %s382_s28, %s383_s29  }
 0x126   :  { %379 = dma.done.wait [#allocation4], 512  }
 0x127   :  { %380 = vsyncadd [#allocation4], 4294966784 }
 0x128   :  { %292 = vsyncpa [#allocation4], 1 }

</bundles_post_ra>
